<compile_context>
chip_gen: v6e
topology: v6e:2x2x1
jax: 0.10.0
libtpu: 0.0.40
codegen_flags: <defaults>
</compile_context>

<pallas_src>
import functools

import jax
import jax.numpy as jnp
from jax.experimental import pallas as pl
from jax.experimental.pallas import tpu as pltpu


# ---------------------------------------------------------------------------
# Kernel
# ---------------------------------------------------------------------------
def _layernorm(x, gamma, beta, eps=1e-5):
    mean = jnp.mean(x, axis=-1, keepdims=True)
    var = jnp.mean((x - mean) ** 2, axis=-1, keepdims=True)   # biased, like nn.LayerNorm
    return (x - mean) * jax.lax.rsqrt(var + eps) * gamma + beta


def transformer_block_kernel(
    x_ref,                       # (Bb*T, E)   activations for Bb whole batch rows
    wqkv_ref,                    # (E, 3*H*E)  fused, pre-transposed q|k|v projection
                                 #             (q columns pre-scaled by E^-0.5)
    wu_ref,                      # (H*E, E)    pre-transposed unify-heads weight
    bu_ref,                      # (1, E)
    g1_ref, b1_ref,              # (1, E)      LayerNorm1 gamma/beta
    wf1_ref, bf1_ref,            # (E, 4E), (1, 4E)
    wf2_ref, bf2_ref,            # (4E, E), (1, E)
    g2_ref, b2_ref,              # (1, E)      LayerNorm2 gamma/beta
    o_ref,                       # (Bb*T, E)
    *, heads, embedding_dim, seq_len, block_b,
):
    H, E, T, Bb = heads, embedding_dim, seq_len, block_b
    HE = H * E
    G = H * Bb                                   # attention batch: (head, batch-row) pairs
    cdt = wqkv_ref.dtype                         # compute dtype for MXU inputs

    x_f32 = x_ref[...].astype(jnp.float32)       # (Bb*T, E); residual path stays f32

    # ---- fused QKV projection: one wide MXU matmul, f32 accumulation ----
    qkv = jnp.dot(x_f32.astype(cdt), wqkv_ref[...],
                  preferred_element_type=jnp.float32)          # (Bb*T, 3*H*E)

    # ---- split once into per-(head, batch-row) slabs: (G, T, E), g = h*Bb + b ----
    # (attention scale already folded into the q weight columns in the wrapper)
    def split_heads(col0):
        slabs = []
        for h in range(H):
            for b in range(Bb):
                slabs.append(qkv[b * T:(b + 1) * T, col0 + h * E: col0 + (h + 1) * E])
        return jnp.stack(slabs, axis=0).astype(cdt)            # (G, T, E)

    q = split_heads(0)
    k = split_heads(HE)
    v = split_heads(2 * HE)

    # ---- batched attention over the leading (head x batch-row) dim ----
    # TODO(synk): for long sequences switch to a flash-style kv grid axis with running
    # max/sum scratch instead of materializing the full (G, T, T) score matrix.
    s = jnp.einsum("gte,gse->gts", q, k,
                   preferred_element_type=jnp.float32)          # (G, T, T) f32
    s = s - jnp.max(s, axis=-1, keepdims=True)
    p = jnp.exp(s)
    denom = jnp.sum(p, axis=-1, keepdims=True)
    r = pl.reciprocal(denom, approx=True)                       # EUP slot (nearly free)
    r = r * (2.0 - denom * r)                                   # one Newton step -> f32 accurate
    p = (p * r).astype(cdt)
    ctx = jnp.einsum("gts,gse->gte", p, v,
                     preferred_element_type=jnp.float32)        # (G, T, E) f32

    # ---- merge heads once, then a single wide unify matmul ----
    rows = []
    for b in range(Bb):
        rows.append(jnp.concatenate([ctx[h * Bb + b] for h in range(H)], axis=-1))  # (T, H*E)
    ctx2d = jnp.concatenate(rows, axis=0)                       # (Bb*T, H*E)
    attended = jnp.dot(ctx2d.astype(cdt), wu_ref[...],
                       preferred_element_type=jnp.float32) + bu_ref[...]            # (Bb*T, E)

    # ---- residual + norm1 (dropout == identity) ----
    x1 = _layernorm(attended + x_f32, g1_ref[...], b1_ref[...])

    # ---- feed-forward ----
    hmid = jnp.dot(x1.astype(cdt), wf1_ref[...],
                   preferred_element_type=jnp.float32) + bf1_ref[...]
    hmid = jnp.maximum(hmid, 0.0)
    ff = jnp.dot(hmid.astype(cdt), wf2_ref[...],
                 preferred_element_type=jnp.float32) + bf2_ref[...]

    # ---- residual + norm2 (dropout == identity) ----
    x2 = _layernorm(ff + x1, g2_ref[...], b2_ref[...])

    o_ref[...] = x2.astype(o_ref.dtype)


# ---------------------------------------------------------------------------
# Wrapper
# ---------------------------------------------------------------------------
def _prep_weights(params, heads, embedding_dim, compute_dtype):
    """Pre-transpose / fuse PyTorch-layout weights into MXU-friendly (in, out) layout.

    The 1/sqrt(E) attention scale is folded into the q columns (equivalent to the
    module's q,k each scaled by E^-0.25), removing all in-kernel scaling.
    """
    q_scale = float(embedding_dim) ** -0.5
    # fused projection, columns ordered [q_h0..q_h(H-1) | k_h0.. | v_h0..]
    w_qkv = jnp.concatenate(
        [params["wq"].T * q_scale, params["wk"].T, params["wv"].T],
        axis=1).astype(compute_dtype)
    w_u = params["wu"].T.astype(compute_dtype)        # (H*E, E)
    w_f1 = params["wf1"].T.astype(compute_dtype)      # (E, 4E)
    w_f2 = params["wf2"].T.astype(compute_dtype)      # (4E, E)
    f32 = lambda a: a.astype(jnp.float32)
    return (w_qkv, w_u, f32(params["bu"]),
            f32(params["g1"]), f32(params["b1"]),
            w_f1, f32(params["bf1"]),
            w_f2, f32(params["bf2"]),
            f32(params["g2"]), f32(params["b2"]))


def transformer_block(x, params, *, heads, block_b=None, compute_dtype=jnp.bfloat16):
    B, T, E = x.shape
    H = heads
    if block_b is None:
        block_b = B                    # fold the whole (small) batch into one block
    assert B % block_b == 0, "block_b must divide the batch"
    n_rows = block_b * T
    assert block_b == B or n_rows % 8 == 0, "row block must be sublane aligned"

    weights = _prep_weights(params, H, E, compute_dtype)
    # Grid-invariant weights: full blocks, constant index map.
    weight_specs = [
        pl.BlockSpec(w.shape, lambda i, nd=w.ndim: (0,) * nd) for w in weights
    ]

    kernel = functools.partial(
        transformer_block_kernel,
        heads=H, embedding_dim=E, seq_len=T, block_b=block_b)

    x_flat = x.reshape(B * T, E).astype(jnp.float32)

    # TODO(synk): for large E / T the all-weights-resident design needs an extra grid
    # axis tiling the FFN / projection weights along their output dim (v7x: 64 MiB VMEM).
    out = pl.pallas_call(
        kernel,
        out_shape=jax.ShapeDtypeStruct((B * T, E), jnp.float32),
        grid_spec=pltpu.PrefetchScalarGridSpec(
            num_scalar_prefetch=0,
            grid=(B // block_b,),
            in_specs=[pl.BlockSpec((n_rows, E), lambda i: (i, 0))] + weight_specs,
            out_specs=pl.BlockSpec((n_rows, E), lambda i: (i, 0)),
        ),
        compiler_params=pltpu.CompilerParams(
            dimension_semantics=("parallel",),
            vmem_limit_bytes=32 * 1024 * 1024,   # plenty; safe on v5e/v6e/v7x
        ),
    )(x_flat, *weights)
    return out.reshape(B, T, E)


# ---------------------------------------------------------------------------
# Pure-JAX reference (for correctness check) — mirrors the PyTorch module.
# ---------------------------------------------------------------------------
def reference(x, p, *, heads):
    B, T, E = x.shape
    H = heads

    def ln(v, g, b, eps=1e-5):
        m = jnp.mean(v, -1, keepdims=True)
        var = jnp.mean((v - m) ** 2, -1, keepdims=True)
        return (v - m) / jnp.sqrt(var + eps) * g + b

    k = (x @ p["wk"].T).reshape(B, T, H, E).transpose(0, 2, 1, 3)
    q = (x @ p["wq"].T).reshape(B, T, H, E).transpose(0, 2, 1, 3)
    v = (x @ p["wv"].T).reshape(B, T, H, E).transpose(0, 2, 1, 3)
    q = q / E ** 0.25
    k = k / E ** 0.25
    dot = jax.nn.softmax(jnp.einsum("bhqe,bhke->bhqk", q, k), axis=-1)
    out = jnp.einsum("bhqk,bhke->bhqe", dot, v).transpose(0, 2, 1, 3).reshape(B, T, H * E)
    attended = out @ p["wu"].T + p["bu"][0]
    x1 = ln(attended + x, p["g1"][0], p["b1"][0])
    ff = jnp.maximum(x1 @ p["wf1"].T + p["bf1"][0], 0.0) @ p["wf2"].T + p["bf2"][0]
    return ln(ff + x1, p["g2"][0], p["b2"][0])


# ---------------------------------------------------------------------------
if __name__ == "__main__":
    B, T, E, H = 2, 8, 32, 4
    FC = 4 * E

    key = jax.random.PRNGKey(0)
    ks = jax.random.split(key, 12)

    def w(k, shape, scale=0.05):
        return jax.random.normal(k, shape, dtype=jnp.float32) * scale

    params = {
        "wk":  w(ks[0], (E * H, E)),
        "wq":  w(ks[1], (E * H, E)),
        "wv":  w(ks[2], (E * H, E)),
        "wu":  w(ks[3], (E, H * E)),
        "bu":  w(ks[4], (1, E)),
        "g1":  jnp.ones((1, E), jnp.float32),
        "b1":  jnp.zeros((1, E), jnp.float32),
        "wf1": w(ks[5], (FC, E)),
        "bf1": w(ks[6], (1, FC)),
        "wf2": w(ks[7], (E, FC)),
        "bf2": w(ks[8], (1, E)),
        "g2":  jnp.ones((1, E), jnp.float32),
        "b2":  jnp.zeros((1, E), jnp.float32),
    }

    x = jax.random.normal(ks[9], (B, T, E), dtype=jnp.float32)

    ref = reference(x, params, heads=H)

    # f32 compute path: exact-ish, tight tolerance.
    out_f32 = jax.block_until_ready(
        transformer_block(x, params, heads=H, compute_dtype=jnp.float32))
    assert out_f32.shape == (B, T, E)
    assert jnp.allclose(out_f32, ref, atol=2e-4, rtol=2e-4), "f32 kernel mismatch vs reference"

    # bf16 compute path (default): MXU-native inputs, f32 accumulation.
    out_bf16 = jax.block_until_ready(
        transformer_block(x, params, heads=H, compute_dtype=jnp.bfloat16))
    assert out_bf16.shape == (B, T, E)
    assert jnp.allclose(out_bf16, ref, atol=5e-2, rtol=5e-2), "bf16 kernel mismatch vs reference"

    # TODO(synk): dropout (p=0.4) is implemented as identity (eval-mode); training-mode
    # stochastic masking would use pltpu.prng_seed / pltpu.stateful_bernoulli.
    print("KERNEL_OK")
</pallas_src>

<mosaic_0001>
module attributes {stable_mosaic.version = 11 : i64} {
  func.func @transformer_block_kernel(%arg0: i32, %arg1: memref<16x32xf32, #tpu.memory_space<vmem>>, %arg2: memref<32x384xf32, #tpu.memory_space<vmem>>, %arg3: memref<128x32xf32, #tpu.memory_space<vmem>>, %arg4: memref<1x32xf32, #tpu.memory_space<vmem>>, %arg5: memref<1x32xf32, #tpu.memory_space<vmem>>, %arg6: memref<1x32xf32, #tpu.memory_space<vmem>>, %arg7: memref<32x128xf32, #tpu.memory_space<vmem>>, %arg8: memref<1x128xf32, #tpu.memory_space<vmem>>, %arg9: memref<128x32xf32, #tpu.memory_space<vmem>>, %arg10: memref<1x32xf32, #tpu.memory_space<vmem>>, %arg11: memref<1x32xf32, #tpu.memory_space<vmem>>, %arg12: memref<1x32xf32, #tpu.memory_space<vmem>>, %arg13: memref<16x32xf32, #tpu.memory_space<vmem>>) attributes {dimension_semantics = [#tpu.dimension_semantics<parallel>], iteration_bounds = array<i64: 1>, scalar_prefetch = 0 : i64, scratch_operands = 0 : i64, tpu.core_type = #tpu.core_type<tc>, window_params = [{transform_indices = @transform_0, window_bounds = array<i64: 16, 32>}, {pipeline_mode = #tpu.pipeline_mode<synchronous>, transform_indices = @transform_1, window_bounds = array<i64: 32, 384>}, {pipeline_mode = #tpu.pipeline_mode<synchronous>, transform_indices = @transform_2, window_bounds = array<i64: 128, 32>}, {pipeline_mode = #tpu.pipeline_mode<synchronous>, transform_indices = @transform_3, window_bounds = array<i64: 1, 32>}, {pipeline_mode = #tpu.pipeline_mode<synchronous>, transform_indices = @transform_4, window_bounds = array<i64: 1, 32>}, {pipeline_mode = #tpu.pipeline_mode<synchronous>, transform_indices = @transform_5, window_bounds = array<i64: 1, 32>}, {pipeline_mode = #tpu.pipeline_mode<synchronous>, transform_indices = @transform_6, window_bounds = array<i64: 32, 128>}, {pipeline_mode = #tpu.pipeline_mode<synchronous>, transform_indices = @transform_7, window_bounds = array<i64: 1, 128>}, {pipeline_mode = #tpu.pipeline_mode<synchronous>, transform_indices = @transform_8, window_bounds = array<i64: 128, 32>}, {pipeline_mode = #tpu.pipeline_mode<synchronous>, transform_indices = @transform_9, window_bounds = array<i64: 1, 32>}, {pipeline_mode = #tpu.pipeline_mode<synchronous>, transform_indices = @transform_10, window_bounds = array<i64: 1, 32>}, {pipeline_mode = #tpu.pipeline_mode<synchronous>, transform_indices = @transform_11, window_bounds = array<i64: 1, 32>}, {transform_indices = @transform_12, window_bounds = array<i64: 16, 32>}]} {
    %c0 = arith.constant 0 : index
    %c0_0 = arith.constant 0 : index
    %0 = vector.load %arg1[%c0, %c0_0] : memref<16x32xf32, #tpu.memory_space<vmem>>, vector<16x32xf32>
    %c0_1 = arith.constant 0 : index
    %c0_2 = arith.constant 0 : index
    %1 = vector.load %arg2[%c0_1, %c0_2] : memref<32x384xf32, #tpu.memory_space<vmem>>, vector<32x384xf32>
    %cst = arith.constant dense<0.000000e+00> : vector<16x384xf32>
    %2 = tpu.matmul %0, %1, %cst {dimension_numbers = #tpu.dot_dimension_numbers<[1], [0], [0], [1], [0, 0, 1, 1], [], []>} : vector<16x32xf32>, vector<32x384xf32>, vector<16x384xf32> -> vector<16x384xf32>
    %3 = vector.extract_strided_slice %2 {offsets = [0, 0], sizes = [8, 32], strides = [1, 1]} : vector<16x384xf32> to vector<8x32xf32>
    %4 = vector.extract_strided_slice %2 {offsets = [8, 0], sizes = [8, 32], strides = [1, 1]} : vector<16x384xf32> to vector<8x32xf32>
    %5 = vector.extract_strided_slice %2 {offsets = [0, 32], sizes = [8, 32], strides = [1, 1]} : vector<16x384xf32> to vector<8x32xf32>
    %6 = vector.extract_strided_slice %2 {offsets = [8, 32], sizes = [8, 32], strides = [1, 1]} : vector<16x384xf32> to vector<8x32xf32>
    %7 = vector.extract_strided_slice %2 {offsets = [0, 64], sizes = [8, 32], strides = [1, 1]} : vector<16x384xf32> to vector<8x32xf32>
    %8 = vector.extract_strided_slice %2 {offsets = [8, 64], sizes = [8, 32], strides = [1, 1]} : vector<16x384xf32> to vector<8x32xf32>
    %9 = vector.extract_strided_slice %2 {offsets = [0, 96], sizes = [8, 32], strides = [1, 1]} : vector<16x384xf32> to vector<8x32xf32>
    %10 = vector.extract_strided_slice %2 {offsets = [8, 96], sizes = [8, 32], strides = [1, 1]} : vector<16x384xf32> to vector<8x32xf32>
    %11 = vector.shape_cast %3 : vector<8x32xf32> to vector<1x8x32xf32>
    %12 = vector.shape_cast %4 : vector<8x32xf32> to vector<1x8x32xf32>
    %13 = vector.shape_cast %5 : vector<8x32xf32> to vector<1x8x32xf32>
    %14 = vector.shape_cast %6 : vector<8x32xf32> to vector<1x8x32xf32>
    %15 = vector.shape_cast %7 : vector<8x32xf32> to vector<1x8x32xf32>
    %16 = vector.shape_cast %8 : vector<8x32xf32> to vector<1x8x32xf32>
    %17 = vector.shape_cast %9 : vector<8x32xf32> to vector<1x8x32xf32>
    %18 = vector.shape_cast %10 : vector<8x32xf32> to vector<1x8x32xf32>
    %19 = tpu.concatenate %11, %12, %13, %14, %15, %16, %17, %18 in 0 : vector<1x8x32xf32>, vector<1x8x32xf32>, vector<1x8x32xf32>, vector<1x8x32xf32>, vector<1x8x32xf32>, vector<1x8x32xf32>, vector<1x8x32xf32>, vector<1x8x32xf32> -> vector<8x8x32xf32>
    %20 = vector.extract_strided_slice %2 {offsets = [0, 128], sizes = [8, 32], strides = [1, 1]} : vector<16x384xf32> to vector<8x32xf32>
    %21 = vector.extract_strided_slice %2 {offsets = [8, 128], sizes = [8, 32], strides = [1, 1]} : vector<16x384xf32> to vector<8x32xf32>
    %22 = vector.extract_strided_slice %2 {offsets = [0, 160], sizes = [8, 32], strides = [1, 1]} : vector<16x384xf32> to vector<8x32xf32>
    %23 = vector.extract_strided_slice %2 {offsets = [8, 160], sizes = [8, 32], strides = [1, 1]} : vector<16x384xf32> to vector<8x32xf32>
    %24 = vector.extract_strided_slice %2 {offsets = [0, 192], sizes = [8, 32], strides = [1, 1]} : vector<16x384xf32> to vector<8x32xf32>
    %25 = vector.extract_strided_slice %2 {offsets = [8, 192], sizes = [8, 32], strides = [1, 1]} : vector<16x384xf32> to vector<8x32xf32>
    %26 = vector.extract_strided_slice %2 {offsets = [0, 224], sizes = [8, 32], strides = [1, 1]} : vector<16x384xf32> to vector<8x32xf32>
    %27 = vector.extract_strided_slice %2 {offsets = [8, 224], sizes = [8, 32], strides = [1, 1]} : vector<16x384xf32> to vector<8x32xf32>
    %28 = vector.shape_cast %20 : vector<8x32xf32> to vector<1x8x32xf32>
    %29 = vector.shape_cast %21 : vector<8x32xf32> to vector<1x8x32xf32>
    %30 = vector.shape_cast %22 : vector<8x32xf32> to vector<1x8x32xf32>
    %31 = vector.shape_cast %23 : vector<8x32xf32> to vector<1x8x32xf32>
    %32 = vector.shape_cast %24 : vector<8x32xf32> to vector<1x8x32xf32>
    %33 = vector.shape_cast %25 : vector<8x32xf32> to vector<1x8x32xf32>
    %34 = vector.shape_cast %26 : vector<8x32xf32> to vector<1x8x32xf32>
    %35 = vector.shape_cast %27 : vector<8x32xf32> to vector<1x8x32xf32>
    %36 = tpu.concatenate %28, %29, %30, %31, %32, %33, %34, %35 in 0 : vector<1x8x32xf32>, vector<1x8x32xf32>, vector<1x8x32xf32>, vector<1x8x32xf32>, vector<1x8x32xf32>, vector<1x8x32xf32>, vector<1x8x32xf32>, vector<1x8x32xf32> -> vector<8x8x32xf32>
    %37 = vector.extract_strided_slice %2 {offsets = [0, 256], sizes = [8, 32], strides = [1, 1]} : vector<16x384xf32> to vector<8x32xf32>
    %38 = vector.extract_strided_slice %2 {offsets = [8, 256], sizes = [8, 32], strides = [1, 1]} : vector<16x384xf32> to vector<8x32xf32>
    %39 = vector.extract_strided_slice %2 {offsets = [0, 288], sizes = [8, 32], strides = [1, 1]} : vector<16x384xf32> to vector<8x32xf32>
    %40 = vector.extract_strided_slice %2 {offsets = [8, 288], sizes = [8, 32], strides = [1, 1]} : vector<16x384xf32> to vector<8x32xf32>
    %41 = vector.extract_strided_slice %2 {offsets = [0, 320], sizes = [8, 32], strides = [1, 1]} : vector<16x384xf32> to vector<8x32xf32>
    %42 = vector.extract_strided_slice %2 {offsets = [8, 320], sizes = [8, 32], strides = [1, 1]} : vector<16x384xf32> to vector<8x32xf32>
    %43 = vector.extract_strided_slice %2 {offsets = [0, 352], sizes = [8, 32], strides = [1, 1]} : vector<16x384xf32> to vector<8x32xf32>
    %44 = vector.extract_strided_slice %2 {offsets = [8, 352], sizes = [8, 32], strides = [1, 1]} : vector<16x384xf32> to vector<8x32xf32>
    %45 = vector.shape_cast %37 : vector<8x32xf32> to vector<1x8x32xf32>
    %46 = vector.shape_cast %38 : vector<8x32xf32> to vector<1x8x32xf32>
    %47 = vector.shape_cast %39 : vector<8x32xf32> to vector<1x8x32xf32>
    %48 = vector.shape_cast %40 : vector<8x32xf32> to vector<1x8x32xf32>
    %49 = vector.shape_cast %41 : vector<8x32xf32> to vector<1x8x32xf32>
    %50 = vector.shape_cast %42 : vector<8x32xf32> to vector<1x8x32xf32>
    %51 = vector.shape_cast %43 : vector<8x32xf32> to vector<1x8x32xf32>
    %52 = vector.shape_cast %44 : vector<8x32xf32> to vector<1x8x32xf32>
    %53 = tpu.concatenate %45, %46, %47, %48, %49, %50, %51, %52 in 0 : vector<1x8x32xf32>, vector<1x8x32xf32>, vector<1x8x32xf32>, vector<1x8x32xf32>, vector<1x8x32xf32>, vector<1x8x32xf32>, vector<1x8x32xf32>, vector<1x8x32xf32> -> vector<8x8x32xf32>
    "tpu.trace_start"() <{level = 10 : i32, message = "gte,gse->gts"}> : () -> ()
    %cst_3 = arith.constant dense<0.000000e+00> : vector<8x8x8xf32>
    %54 = tpu.matmul %19, %36, %cst_3 {dimension_numbers = #tpu.dot_dimension_numbers<[2], [2], [1], [1], [0, 0, 0, 1, 1, 1], [0], [0]>} : vector<8x8x32xf32>, vector<8x8x32xf32>, vector<8x8x8xf32> -> vector<8x8x8xf32>
    "tpu.trace_stop"() : () -> ()
    %cst_4 = arith.constant dense<0xFF800000> : vector<8x8xf32>
    %55 = vector.multi_reduction <maximumf>, %54, %cst_4 [2] : vector<8x8x8xf32> to vector<8x8xf32>
    %56 = vector.shape_cast %55 : vector<8x8xf32> to vector<8x8x1xf32>
    %57 = vector.broadcast %56 : vector<8x8x1xf32> to vector<8x8x8xf32>
    %58 = arith.subf %54, %57 : vector<8x8x8xf32>
    %59 = math.exp %58 : vector<8x8x8xf32>
    %cst_5 = arith.constant dense<0.000000e+00> : vector<8x8xf32>
    %60 = vector.multi_reduction <add>, %59, %cst_5 [2] : vector<8x8x8xf32> to vector<8x8xf32>
    %61 = vector.shape_cast %60 : vector<8x8xf32> to vector<8x8x1xf32>
    %62 = tpu.reciprocal %61 {approx = true} : vector<8x8x1xf32> -> vector<8x8x1xf32>
    %63 = arith.mulf %61, %62 : vector<8x8x1xf32>
    %cst_6 = arith.constant 2.000000e+00 : f32
    %64 = vector.broadcast %cst_6 : f32 to vector<8x8x1xf32>
    %65 = arith.subf %64, %63 : vector<8x8x1xf32>
    %66 = arith.mulf %62, %65 : vector<8x8x1xf32>
    %67 = vector.broadcast %66 : vector<8x8x1xf32> to vector<8x8x8xf32>
    %68 = arith.mulf %59, %67 : vector<8x8x8xf32>
    "tpu.trace_start"() <{level = 10 : i32, message = "gts,gse->gte"}> : () -> ()
    %cst_7 = arith.constant dense<0.000000e+00> : vector<8x8x32xf32>
    %69 = tpu.matmul %68, %53, %cst_7 {dimension_numbers = #tpu.dot_dimension_numbers<[2], [1], [1], [2], [0, 0, 0, 1, 1, 2], [0], [0]>} : vector<8x8x8xf32>, vector<8x8x32xf32>, vector<8x8x32xf32> -> vector<8x8x32xf32>
    "tpu.trace_stop"() : () -> ()
    %70 = vector.extract_strided_slice %69 {offsets = [0, 0, 0], sizes = [1, 8, 32], strides = [1, 1, 1]} : vector<8x8x32xf32> to vector<1x8x32xf32>
    %71 = vector.shape_cast %70 : vector<1x8x32xf32> to vector<8x32xf32>
    %72 = vector.extract_strided_slice %69 {offsets = [2, 0, 0], sizes = [1, 8, 32], strides = [1, 1, 1]} : vector<8x8x32xf32> to vector<1x8x32xf32>
    %73 = vector.shape_cast %72 : vector<1x8x32xf32> to vector<8x32xf32>
    %74 = vector.extract_strided_slice %69 {offsets = [4, 0, 0], sizes = [1, 8, 32], strides = [1, 1, 1]} : vector<8x8x32xf32> to vector<1x8x32xf32>
    %75 = vector.shape_cast %74 : vector<1x8x32xf32> to vector<8x32xf32>
    %76 = vector.extract_strided_slice %69 {offsets = [6, 0, 0], sizes = [1, 8, 32], strides = [1, 1, 1]} : vector<8x8x32xf32> to vector<1x8x32xf32>
    %77 = vector.shape_cast %76 : vector<1x8x32xf32> to vector<8x32xf32>
    %78 = tpu.concatenate %71, %73, %75, %77 in 1 : vector<8x32xf32>, vector<8x32xf32>, vector<8x32xf32>, vector<8x32xf32> -> vector<8x128xf32>
    %79 = vector.extract_strided_slice %69 {offsets = [1, 0, 0], sizes = [1, 8, 32], strides = [1, 1, 1]} : vector<8x8x32xf32> to vector<1x8x32xf32>
    %80 = vector.shape_cast %79 : vector<1x8x32xf32> to vector<8x32xf32>
    %81 = vector.extract_strided_slice %69 {offsets = [3, 0, 0], sizes = [1, 8, 32], strides = [1, 1, 1]} : vector<8x8x32xf32> to vector<1x8x32xf32>
    %82 = vector.shape_cast %81 : vector<1x8x32xf32> to vector<8x32xf32>
    %83 = vector.extract_strided_slice %69 {offsets = [5, 0, 0], sizes = [1, 8, 32], strides = [1, 1, 1]} : vector<8x8x32xf32> to vector<1x8x32xf32>
    %84 = vector.shape_cast %83 : vector<1x8x32xf32> to vector<8x32xf32>
    %85 = vector.extract_strided_slice %69 {offsets = [7, 0, 0], sizes = [1, 8, 32], strides = [1, 1, 1]} : vector<8x8x32xf32> to vector<1x8x32xf32>
    %86 = vector.shape_cast %85 : vector<1x8x32xf32> to vector<8x32xf32>
    %87 = tpu.concatenate %80, %82, %84, %86 in 1 : vector<8x32xf32>, vector<8x32xf32>, vector<8x32xf32>, vector<8x32xf32> -> vector<8x128xf32>
    %88 = tpu.concatenate %78, %87 in 0 : vector<8x128xf32>, vector<8x128xf32> -> vector<16x128xf32>
    %c0_8 = arith.constant 0 : index
    %c0_9 = arith.constant 0 : index
    %89 = vector.load %arg3[%c0_8, %c0_9] : memref<128x32xf32, #tpu.memory_space<vmem>>, vector<128x32xf32>
    %cst_10 = arith.constant dense<0.000000e+00> : vector<16x32xf32>
    %90 = tpu.matmul %88, %89, %cst_10 {dimension_numbers = #tpu.dot_dimension_numbers<[1], [0], [0], [1], [0, 0, 1, 1], [], []>} : vector<16x128xf32>, vector<128x32xf32>, vector<16x32xf32> -> vector<16x32xf32>
    %c0_11 = arith.constant 0 : index
    %c0_12 = arith.constant 0 : index
    %91 = vector.load %arg4[%c0_11, %c0_12] : memref<1x32xf32, #tpu.memory_space<vmem>>, vector<1x32xf32>
    %92 = vector.broadcast %91 : vector<1x32xf32> to vector<16x32xf32>
    %93 = arith.addf %90, %92 : vector<16x32xf32>
    %94 = arith.addf %93, %0 : vector<16x32xf32>
    %c0_13 = arith.constant 0 : index
    %c0_14 = arith.constant 0 : index
    %95 = vector.load %arg5[%c0_13, %c0_14] : memref<1x32xf32, #tpu.memory_space<vmem>>, vector<1x32xf32>
    %c0_15 = arith.constant 0 : index
    %c0_16 = arith.constant 0 : index
    %96 = vector.load %arg6[%c0_15, %c0_16] : memref<1x32xf32, #tpu.memory_space<vmem>>, vector<1x32xf32>
    %cst_17 = arith.constant dense<0.000000e+00> : vector<16xf32>
    %97 = vector.multi_reduction <add>, %94, %cst_17 [1] : vector<16x32xf32> to vector<16xf32>
    %98 = vector.shape_cast %97 : vector<16xf32> to vector<16x1xf32>
    %cst_18 = arith.constant 3.200000e+01 : f32
    %99 = vector.broadcast %cst_18 : f32 to vector<16x1xf32>
    %100 = arith.divf %98, %99 : vector<16x1xf32>
    %101 = vector.broadcast %100 : vector<16x1xf32> to vector<16x32xf32>
    %102 = arith.subf %94, %101 : vector<16x32xf32>
    %103 = arith.mulf %102, %102 : vector<16x32xf32>
    %cst_19 = arith.constant dense<0.000000e+00> : vector<16xf32>
    %104 = vector.multi_reduction <add>, %103, %cst_19 [1] : vector<16x32xf32> to vector<16xf32>
    %105 = vector.shape_cast %104 : vector<16xf32> to vector<16x1xf32>
    %cst_20 = arith.constant 3.200000e+01 : f32
    %106 = vector.broadcast %cst_20 : f32 to vector<16x1xf32>
    %107 = arith.divf %105, %106 : vector<16x1xf32>
    %108 = vector.broadcast %100 : vector<16x1xf32> to vector<16x32xf32>
    %109 = arith.subf %94, %108 : vector<16x32xf32>
    %cst_21 = arith.constant 9.99999974E-6 : f32
    %110 = vector.broadcast %cst_21 : f32 to vector<16x1xf32>
    %111 = arith.addf %107, %110 : vector<16x1xf32>
    %112 = math.rsqrt %111 : vector<16x1xf32>
    %113 = vector.broadcast %112 : vector<16x1xf32> to vector<16x32xf32>
    %114 = arith.mulf %109, %113 : vector<16x32xf32>
    %115 = vector.broadcast %95 : vector<1x32xf32> to vector<16x32xf32>
    %116 = arith.mulf %114, %115 : vector<16x32xf32>
    %117 = vector.broadcast %96 : vector<1x32xf32> to vector<16x32xf32>
    %118 = arith.addf %116, %117 : vector<16x32xf32>
    %c0_22 = arith.constant 0 : index
    %c0_23 = arith.constant 0 : index
    %119 = vector.load %arg7[%c0_22, %c0_23] : memref<32x128xf32, #tpu.memory_space<vmem>>, vector<32x128xf32>
    %cst_24 = arith.constant dense<0.000000e+00> : vector<16x128xf32>
    %120 = tpu.matmul %118, %119, %cst_24 {dimension_numbers = #tpu.dot_dimension_numbers<[1], [0], [0], [1], [0, 0, 1, 1], [], []>} : vector<16x32xf32>, vector<32x128xf32>, vector<16x128xf32> -> vector<16x128xf32>
    %c0_25 = arith.constant 0 : index
    %c0_26 = arith.constant 0 : index
    %121 = vector.load %arg8[%c0_25, %c0_26] : memref<1x128xf32, #tpu.memory_space<vmem>>, vector<1x128xf32>
    %122 = vector.broadcast %121 : vector<1x128xf32> to vector<16x128xf32>
    %123 = arith.addf %120, %122 : vector<16x128xf32>
    %cst_27 = arith.constant 0.000000e+00 : f32
    %124 = vector.broadcast %cst_27 : f32 to vector<16x128xf32>
    %125 = arith.maximumf %123, %124 : vector<16x128xf32>
    %c0_28 = arith.constant 0 : index
    %c0_29 = arith.constant 0 : index
    %126 = vector.load %arg9[%c0_28, %c0_29] : memref<128x32xf32, #tpu.memory_space<vmem>>, vector<128x32xf32>
    %cst_30 = arith.constant dense<0.000000e+00> : vector<16x32xf32>
    %127 = tpu.matmul %125, %126, %cst_30 {dimension_numbers = #tpu.dot_dimension_numbers<[1], [0], [0], [1], [0, 0, 1, 1], [], []>} : vector<16x128xf32>, vector<128x32xf32>, vector<16x32xf32> -> vector<16x32xf32>
    %c0_31 = arith.constant 0 : index
    %c0_32 = arith.constant 0 : index
    %128 = vector.load %arg10[%c0_31, %c0_32] : memref<1x32xf32, #tpu.memory_space<vmem>>, vector<1x32xf32>
    %129 = vector.broadcast %128 : vector<1x32xf32> to vector<16x32xf32>
    %130 = arith.addf %127, %129 : vector<16x32xf32>
    %131 = arith.addf %130, %118 : vector<16x32xf32>
    %c0_33 = arith.constant 0 : index
    %c0_34 = arith.constant 0 : index
    %132 = vector.load %arg11[%c0_33, %c0_34] : memref<1x32xf32, #tpu.memory_space<vmem>>, vector<1x32xf32>
    %c0_35 = arith.constant 0 : index
    %c0_36 = arith.constant 0 : index
    %133 = vector.load %arg12[%c0_35, %c0_36] : memref<1x32xf32, #tpu.memory_space<vmem>>, vector<1x32xf32>
    %cst_37 = arith.constant dense<0.000000e+00> : vector<16xf32>
    %134 = vector.multi_reduction <add>, %131, %cst_37 [1] : vector<16x32xf32> to vector<16xf32>
    %135 = vector.shape_cast %134 : vector<16xf32> to vector<16x1xf32>
    %cst_38 = arith.constant 3.200000e+01 : f32
    %136 = vector.broadcast %cst_38 : f32 to vector<16x1xf32>
    %137 = arith.divf %135, %136 : vector<16x1xf32>
    %138 = vector.broadcast %137 : vector<16x1xf32> to vector<16x32xf32>
    %139 = arith.subf %131, %138 : vector<16x32xf32>
    %140 = arith.mulf %139, %139 : vector<16x32xf32>
    %cst_39 = arith.constant dense<0.000000e+00> : vector<16xf32>
    %141 = vector.multi_reduction <add>, %140, %cst_39 [1] : vector<16x32xf32> to vector<16xf32>
    %142 = vector.shape_cast %141 : vector<16xf32> to vector<16x1xf32>
    %cst_40 = arith.constant 3.200000e+01 : f32
    %143 = vector.broadcast %cst_40 : f32 to vector<16x1xf32>
    %144 = arith.divf %142, %143 : vector<16x1xf32>
    %145 = vector.broadcast %137 : vector<16x1xf32> to vector<16x32xf32>
    %146 = arith.subf %131, %145 : vector<16x32xf32>
    %cst_41 = arith.constant 9.99999974E-6 : f32
    %147 = vector.broadcast %cst_41 : f32 to vector<16x1xf32>
    %148 = arith.addf %144, %147 : vector<16x1xf32>
    %149 = math.rsqrt %148 : vector<16x1xf32>
    %150 = vector.broadcast %149 : vector<16x1xf32> to vector<16x32xf32>
    %151 = arith.mulf %146, %150 : vector<16x32xf32>
    %152 = vector.broadcast %132 : vector<1x32xf32> to vector<16x32xf32>
    %153 = arith.mulf %151, %152 : vector<16x32xf32>
    %154 = vector.broadcast %133 : vector<1x32xf32> to vector<16x32xf32>
    %155 = arith.addf %153, %154 : vector<16x32xf32>
    %c0_42 = arith.constant 0 : index
    %c0_43 = arith.constant 0 : index
    %156 = vector.load %arg13[%c0_42, %c0_43] : memref<16x32xf32, #tpu.memory_space<vmem>>, vector<16x32xf32>
    tpu.vector_store %arg13[%c0_42, %c0_43], %155 {strides = array<i32>} : memref<16x32xf32, #tpu.memory_space<vmem>>, vector<16x32xf32>,
    return
  }
  func.func @transform_0(%arg0: i32) -> (i32, i32) {
    %c0_i32 = arith.constant 0 : i32
    %c0_i32_0 = arith.constant 0 : i32
    return %arg0, %c0_i32 : i32, i32
  }
  func.func @transform_1(%arg0: i32) -> (i32, i32) {
    %c0_i32 = arith.constant 0 : i32
    %c0_i32_0 = arith.constant 0 : i32
    %c0_i32_1 = arith.constant 0 : i32
    return %c0_i32, %c0_i32_0 : i32, i32
  }
  func.func @transform_2(%arg0: i32) -> (i32, i32) {
    %c0_i32 = arith.constant 0 : i32
    %c0_i32_0 = arith.constant 0 : i32
    %c0_i32_1 = arith.constant 0 : i32
    return %c0_i32, %c0_i32_0 : i32, i32
  }
  func.func @transform_3(%arg0: i32) -> (i32, i32) {
    %c0_i32 = arith.constant 0 : i32
    %c0_i32_0 = arith.constant 0 : i32
    %c0_i32_1 = arith.constant 0 : i32
    return %c0_i32, %c0_i32_0 : i32, i32
  }
  func.func @transform_4(%arg0: i32) -> (i32, i32) {
    %c0_i32 = arith.constant 0 : i32
    %c0_i32_0 = arith.constant 0 : i32
    %c0_i32_1 = arith.constant 0 : i32
    return %c0_i32, %c0_i32_0 : i32, i32
  }
  func.func @transform_5(%arg0: i32) -> (i32, i32) {
    %c0_i32 = arith.constant 0 : i32
    %c0_i32_0 = arith.constant 0 : i32
    %c0_i32_1 = arith.constant 0 : i32
    return %c0_i32, %c0_i32_0 : i32, i32
  }
  func.func @transform_6(%arg0: i32) -> (i32, i32) {
    %c0_i32 = arith.constant 0 : i32
    %c0_i32_0 = arith.constant 0 : i32
    %c0_i32_1 = arith.constant 0 : i32
    return %c0_i32, %c0_i32_0 : i32, i32
  }
  func.func @transform_7(%arg0: i32) -> (i32, i32) {
    %c0_i32 = arith.constant 0 : i32
    %c0_i32_0 = arith.constant 0 : i32
    %c0_i32_1 = arith.constant 0 : i32
    return %c0_i32, %c0_i32_0 : i32, i32
  }
  func.func @transform_8(%arg0: i32) -> (i32, i32) {
    %c0_i32 = arith.constant 0 : i32
    %c0_i32_0 = arith.constant 0 : i32
    %c0_i32_1 = arith.constant 0 : i32
    return %c0_i32, %c0_i32_0 : i32, i32
  }
  func.func @transform_9(%arg0: i32) -> (i32, i32) {
    %c0_i32 = arith.constant 0 : i32
    %c0_i32_0 = arith.constant 0 : i32
    %c0_i32_1 = arith.constant 0 : i32
    return %c0_i32, %c0_i32_0 : i32, i32
  }
  func.func @transform_10(%arg0: i32) -> (i32, i32) {
    %c0_i32 = arith.constant 0 : i32
    %c0_i32_0 = arith.constant 0 : i32
    %c0_i32_1 = arith.constant 0 : i32
    return %c0_i32, %c0_i32_0 : i32, i32
  }
  func.func @transform_11(%arg0: i32) -> (i32, i32) {
    %c0_i32 = arith.constant 0 : i32
    %c0_i32_0 = arith.constant 0 : i32
    %c0_i32_1 = arith.constant 0 : i32
    return %c0_i32, %c0_i32_0 : i32, i32
  }
  func.func @transform_12(%arg0: i32) -> (i32, i32) {
    %c0_i32 = arith.constant 0 : i32
    %c0_i32_0 = arith.constant 0 : i32
    return %arg0, %c0_i32 : i32, i32
  }
}

</mosaic_0001>

<bundles_post_ra>
// kernel: tpu_custom_call.1
= control target key start
LH: loop header
LB: loop body
LE: loop exit
PB: predicated region body
PF: predicated region fallthrough
CT: control target
= control target key end

     0   :  { %v2359_v4 = vmov 0.0   ;;  %s2800_s0 = inlined_call_operand.vmem [shape: f32[16,32], index: 0, kind: input, shape index: {}]   ;;  %s2801_s1 = inlined_call_operand.vmem [shape: f32[32,384], index: 1, kind: input, shape index: {}]   ;;  %s2802_s2 = inlined_call_operand.vmem [shape: f32[128,32], index: 2, kind: input, shape index: {}]   ;;  %s2803_s3 = inlined_call_operand.vmem [shape: f32[1,32], index: 3, kind: input, shape index: {}]   ;;  %s2804_s4 = inlined_call_operand.vmem [shape: f32[1,32], index: 4, kind: input, shape index: {}]   ;;  %s2805_s5 = inlined_call_operand.vmem [shape: f32[1,32], index: 5, kind: input, shape index: {}]   ;;  %s2806_s6 = inlined_call_operand.vmem [shape: f32[32,128], index: 6, kind: input, shape index: {}]   ;;  %s2807_s7 = inlined_call_operand.vmem [shape: f32[1,128], index: 7, kind: input, shape index: {}]   ;;  %s2808_s8 = inlined_call_operand.vmem [shape: f32[128,32], index: 8, kind: input, shape index: {}]   ;;  %s2809_s9 = inlined_call_operand.vmem [shape: f32[1,32], index: 9, kind: input, shape index: {}]   ;;  %s2810_s10 = inlined_call_operand.vmem [shape: f32[1,32], index: 10, kind: input, shape index: {}]   ;;  %s2811_s11 = inlined_call_operand.vmem [shape: f32[1,32], index: 11, kind: input, shape index: {}]   ;;  %s2812_s12 = inlined_call_operand.hbm [shape: f32[16,32], index: 12, kind: output, shape index: {}]  }
   0x1   :  { %v54_v0 = vld [vmem:[%s2801_s1 + $0x50] sm:$0xff]  ;;  %v53_v1 = vld [vmem:[%s2801_s1 + $0x48] sm:$0xff]  ;;  %v51_v2 = vld [vmem:[%s2801_s1 + $0x38] sm:$0xff]  ;;  %127 = vmatprep.mubr.f32.mxu1 %v2359_v4  ;;  %2113 = vmatprep.subr.mxu0 %v2359_v4 }
   0x2   :  { %87 = vmatprep.subr.mxu1 %v54_v0  ;;  %v50_v3 = vld [vmem:[%s2801_s1 + $0x30] sm:$0xff]  ;;  %v48_v5 = vld [vmem:[%s2801_s1 + $0x20] sm:$0xff]  ;;  %v47_v6 = vld [vmem:[%s2801_s1 + $0x18] sm:$0xff] }
   0x3   :  { %88 = vmatpush1.msra.mxu1 %v53_v1 }
   0x4   :  { %89 = vmatprep.subr.mxu1 %v51_v2 }
   0x5   :  { %17 = vsyncpa [#allocation3], 0  ;;  %90 = vmatpush1.msra.mxu1 %v50_v3  ;;  %v45_v7 = vld [vmem:[%s2801_s1 + $0x8] sm:$0xff]  ;;  %v44_v8 = vld [vmem:[%s2801_s1] sm:$0xff]  ;;  %vm56_vm0 = vcmask 261120   ;;  %vm2360_vm1 = vmmov 0  }
   0x6   :  { %91 = vmatprep.subr.mxu1 %v48_v5  ;;  %v2461_v9 = vld [vmem:[%s2800_s0] sm:$0xff]  ;;  %v2469_v10 = vld [vmem:[%s2800_s0 + $0x8] sm:$0xff]  ;;  %2115 = vmatprep.mubr.msk.f32.mxu0 %vm2360_vm1, %v2359_v4  ;;  %v55_v11 = vld [vmem:[%s2801_s1 + $0x58] sm:$0xff]  ;;  %s2361_s30 = smov 96   ;;  %s2363_s13 = smov 32   ;;  %vm855_vm2 = vcmask 64512  }
   0x7   :  { %92 = vmatpush1.msra.mxu1 %v47_v6  ;;  %v52_v12 = vld [vmem:[%s2801_s1 + $0x40] sm:$0xff]  ;;  %v49_v13 = vld [vmem:[%s2801_s1 + $0x28] sm:$0xff]  ;;  %v46_v14 = vld [vmem:[%s2801_s1 + $0x10] sm:$0xff]  ;;  %s2362_s1 = smov 64   ;;  %vm1565_vm3 = vcmask 523264   ;;  %vm1567_vm4 = vcmask 785408  }
   0x8   :  { %93 = vmatprep.subr.mxu1 %v45_v7 }
   0x9   :  { %94 = vmatpush1.msra.mxu1 %v44_v8 }
   0xa   :  { %1985 = vmatmul.mubr.msk.f32.vlgmr.msra.gmra.mxu1 %vm56_vm0, %v2461_v9  ;;  %2102 = vmatprep.subr.mxu1 %v55_v11 }
   0xb   :  { %133 = vmatprep.mubr.f32.mxu1 %v2359_v4  ;;  %2103 = vmatpush3.msra.mxu1 %v55_v11 }
   0xc   :  { %2104 = vmatprep.subr.mxu1 %v52_v12 }
   0xd   :  { %2105 = vmatpush3.msra.mxu1 %v52_v12 }
   0xe   :  { %1986 = vmatmul.mubr.msk.f32.gmra.mxu1 %vm56_vm0, %v2469_v10  ;;  %2106 = vmatprep.subr.mxu1 %v49_v13 }
   0xf   :  { %2110 = vmatprep.mubr.msk.f32.mxu1 %vm56_vm0, %v2461_v9  ;;  %2107 = vmatpush3.msra.mxu1 %v49_v13 }
  0x10   :  { %2108 = vmatprep.subr.mxu1 %v46_v14 }
  0x11   :  { %2109 = vmatpush3.msra.mxu1 %v46_v14 }
  0x12   :  { %2111 = vmatmul.mubr.msk.f32.vlgmr.msra.gmra.mxu1 %vm56_vm0, %v2469_v10  ;;  %2123 = vmatprep.subr.mxu1 %v2359_v4 }
  0x13   :  { %2125 = vmatprep.mubr.msk.f32.mxu1 %vm2360_vm1, %v2359_v4 }
  0xca   :  { %v129_v15 = vpop.f32.mrf.mxu1 }
  0xcb   :  { %216 = vrot.lane.b32.xlu1 %v129_v15, %s2361_s30 }
  0xcc   :  { %v131_v16 = vpop.f32.mrf.mxu1 }
  0xcd   :  { %230 = vrot.lane.b32.xlu0 %v131_v16, %s2361_s30  ;;  %2114 = vmatpush3.xpose.msk.msra.mxu0 %vm56_vm0, %v131_v16 }
  0xce   :  { %v135_v17 = vpop.f32.mrf.mxu1  ;;  %2118 = vmatprep.subr.mxu0 %v2359_v4 }
  0xcf   :  { %219 = vrot.lane.b32.xlu1 %v135_v17, %s2361_s30 }
  0xd0   :  { %v137_v18 = vpop.f32.mrf.mxu1  ;;  %2116 = vmatmul.mubr.msk.f32.vlgmr.msra.gmra.mxu0 %vm56_vm0, %v129_v15 }
  0xd1   :  { %235 = vrot.lane.b32.xlu0 %v131_v16, %s2362_s1  ;;  %2119 = vmatpush3.xpose.msk.msra.mxu0 %vm56_vm0, %v137_v18 }
  0xd2   :  { %2120 = vmatprep.mubr.msk.f32.mxu0 %vm2360_vm1, %v2359_v4  ;;  %2128 = vmatprep.subr.mxu0 %v2359_v4  ;;  %v2536_v29 = vpop.f32.mrf.mxu1 }
  0xd3   :  { %223 = vrot.lane.b32.xlu1 %v135_v17, %s2362_s1 }
  0xd4   :  { %2121 = vmatmul.mubr.msk.f32.vlgmr.msra.gmra.mxu0 %vm56_vm0, %v135_v17  ;;  %v2544_v32 = vpop.f32.mrf.mxu1 }
  0xd5   :  { %233 = vrot.lane.b32.xlu0 %v137_v18, %s2361_s30  ;;  %2130 = vmatprep.mubr.msk.f32.mxu0 %vm2360_vm1, %v2359_v4 }
  0xd7   :  { %237 = vrot.lane.b32.xlu1 %v137_v18, %s2362_s1 }
  0xd9   :  { %221 = vrot.lane.b32.xlu0 %v129_v15, %s2362_s1 }
  0xdb   :  { %241 = vrot.lane.b32.xlu1 %v137_v18, %s2363_s13 }
  0xdd   :  { %239 = vrot.lane.b32.xlu0 %v131_v16, %s2363_s13 }
  0xdf   :  { %227 = vrot.lane.b32.xlu1 %v135_v17, %s2363_s13 }
  0xe1   :  { %225 = vrot.lane.b32.xlu0 %v129_v15, %s2363_s13 }
 0x13d   :  { %v217_v19 = vpop.permute.xlu1 %216 }
 0x13f   :  { %v231_v20 = vpop.permute.xlu0 %230 }
 0x140   :  { %2124 = vmatpush3.xpose.msk.msra.mxu1 %vm56_vm0, %v231_v20 }
 0x141   :  { %v220_v21 = vpop.permute.xlu1 %219  ;;  %2133 = vmatprep.subr.mxu1 %v2359_v4 }
 0x143   :  { %2126 = vmatmul.mubr.msk.f32.vlgmr.msra.gmra.mxu1 %vm56_vm0, %v217_v19  ;;  %v236_v22 = vpop.permute.xlu0 %235 }
 0x144   :  { %2134 = vmatpush3.xpose.msk.msra.mxu1 %vm56_vm0, %v236_v22  ;;  %2135 = vmatprep.mubr.msk.f32.mxu1 %vm2360_vm1, %v2359_v4 }
 0x145   :  { %v224_v23 = vpop.permute.xlu1 %223  ;;  %2143 = vmatprep.subr.mxu1 %v2359_v4 }
 0x147   :  { %v234_v24 = vpop.permute.xlu0 %233 }
 0x148   :  { %2129 = vmatpush3.xpose.msk.msra.mxu0 %vm56_vm0, %v234_v24 }
 0x149   :  { %v238_v25 = vpop.permute.xlu1 %237  ;;  %2138 = vmatprep.subr.mxu0 %v2359_v4 }
 0x14b   :  { %v222_v26 = vpop.permute.xlu0 %221  ;;  %2131 = vmatmul.mubr.msk.f32.vlgmr.msra.gmra.mxu0 %vm56_vm0, %v220_v21 }
 0x14c   :  { %2136 = vmatmul.mubr.msk.f32.vlgmr.msra.gmra.mxu1 %vm56_vm0, %v222_v26  ;;  %2139 = vmatpush3.xpose.msk.msra.mxu0 %vm56_vm0, %v238_v25 }
 0x14d   :  { %v242_v27 = vpop.permute.xlu1 %241  ;;  %2140 = vmatprep.mubr.msk.f32.mxu0 %vm2360_vm1, %v2359_v4  ;;  %2148 = vmatprep.subr.mxu0 %v2359_v4 }
 0x14e   :  { %2145 = vmatprep.mubr.msk.f32.mxu1 %vm2360_vm1, %v2359_v4 }
 0x14f   :  { %v240_v28 = vpop.permute.xlu0 %239  ;;  %2141 = vmatmul.mubr.msk.f32.vlgmr.msra.gmra.mxu0 %vm56_vm0, %v224_v23 }
 0x150   :  { %2144 = vmatpush3.xpose.msk.msra.mxu1 %vm56_vm0, %v240_v28  ;;  %2149 = vmatpush3.xpose.msk.msra.mxu0 %vm56_vm0, %v242_v27 }
 0x151   :  { %v228_v30 = vpop.permute.xlu1 %227  ;;  %2150 = vmatprep.mubr.msk.f32.mxu0 %vm2360_vm1, %v2359_v4  ;;  %2153 = vmatprep.subr.mxu1 %v2359_v4 }
 0x152   :  { %2158 = vmatprep.subr.mxu0 %v2359_v4 }
 0x153   :  { %v226_v31 = vpop.permute.xlu0 %225  ;;  %2151 = vmatmul.mubr.msk.f32.vlgmr.msra.gmra.mxu0 %vm56_vm0, %v228_v30 }
 0x154   :  { %2146 = vmatmul.mubr.msk.f32.vlgmr.msra.gmra.mxu1 %vm56_vm0, %v226_v31  ;;  %2159 = vmatpush3.msra.mxu0 %v2536_v29 }
 0x155   :  { %2154 = vmatpush3.msra.mxu1 %v2544_v32  ;;  %2160 = vmatprep.mubr.msk.f32.mxu0 %vm2360_vm1, %v2359_v4 }
 0x156   :  { %2155 = vmatprep.mubr.msk.f32.mxu1 %vm2360_vm1, %v2359_v4  ;;  %2163 = vmatprep.subr.mxu1 %v2359_v4 }
 0x157   :  { %2168 = vmatprep.subr.mxu0 %v2359_v4 }
 0x190   :  { %v333_v33 = vpop.f32.mrf.mxu0 }
 0x191   :  { %v856_v34 = vsel %vm855_vm2, %v333_v33, -inf }
 0x192   :  { %v2117_v35 = vpop.f32.mrf.mxu0  ;;  %857 = vmax.xlane.f32.xlu0 %v856_v34 }
 0x194   :  { %v407_v36 = vpop.f32.mrf.mxu0 }
 0x195   :  { %v859_v37 = vsel %vm855_vm2, %v407_v36, -inf }
 0x196   :  { %860 = vmax.xlane.f32.xlu1 %v859_v37  ;;  %v2122_v38 = vpop.f32.mrf.mxu0 }
 0x203   :  { %v481_v39 = vpop.f32.mrf.mxu1 }
 0x204   :  { %v862_v40 = vsel %vm855_vm2, %v481_v39, -inf }
 0x205   :  { %863 = vmax.xlane.f32.xlu0 %v862_v40  ;;  %v2127_v41 = vpop.f32.mrf.mxu1 }
 0x20b   :  { %v555_v42 = vpop.f32.mrf.mxu0 }
 0x20c   :  { %v629_v43 = vpop.f32.mrf.mxu1  ;;  %v865_v44 = vsel %vm855_vm2, %v555_v42, -inf }
 0x20d   :  { %v2132_v45 = vpop.f32.mrf.mxu0  ;;  %866 = vmax.xlane.f32.xlu0 %v865_v44  ;;  %v868_v46 = vsel %vm855_vm2, %v629_v43, -inf }
 0x20e   :  { %869 = vmax.xlane.f32.xlu1 %v868_v46  ;;  %v2137_v47 = vpop.f32.mrf.mxu1 }
 0x20f   :  { %v703_v48 = vpop.f32.mrf.mxu0 }
 0x210   :  { %v871_v49 = vsel %vm855_vm2, %v703_v48, -inf }
 0x211   :  { %v2142_v50 = vpop.f32.mrf.mxu0  ;;  %872 = vmax.xlane.f32.xlu0 %v871_v49 }
 0x213   :  { %v851_v51 = vpop.f32.mrf.mxu0 }
 0x214   :  { %v777_v52 = vpop.f32.mrf.mxu1  ;;  %v877_v53 = vsel %vm855_vm2, %v851_v51, -inf }
 0x215   :  { %v2152_v54 = vpop.f32.mrf.mxu0  ;;  %878 = vmax.xlane.f32.xlu0 %v877_v53  ;;  %v874_v55 = vsel %vm855_vm2, %v777_v52, -inf }
 0x216   :  { %875 = vmax.xlane.f32.xlu1 %v874_v55  ;;  %v2147_v56 = vpop.f32.mrf.mxu1 }
 0x21b   :  { %v858_v60 = vpop.xlane.xlu0 %857 }
 0x21c   :  { %v880_v62 = vsub.f32 %v333_v33, %v858_v60 }
 0x21e   :  { %v888_v0 = vmul.f32 1.442695, %v880_v62 }
 0x21f   :  { %v861_v57 = vpop.xlane.xlu1 %860 }
 0x220   :  { %v881_v58 = vsub.f32 %v407_v36, %v861_v57 }
 0x222   :  { %v890_v59 = vmul.f32 1.442695, %v881_v58 }
 0x224   :  { %2297 = vpow2.f32 %v890_v59 }
 0x225   :  { %2299 = vpow2.f32 %v888_v0 }
 0x227   :  { %244 = vrot.lane.b32.xlu1 %v2544_v32, %s2361_s30 }
 0x231   :  { %v2564_v61 = vpop.eup %2297 }
 0x232   :  { %v907_v63 = vsel %vm855_vm2, %v2564_v61, 0.0  ;;  %v2568_v1 = vpop.eup %2299 }
 0x233   :  { %908 = vadd.xlane.f32.xlu0 %v907_v63  ;;  %v904_v2 = vsel %vm855_vm2, %v2568_v1, 0.0 }
 0x24b   :  { %905 = vadd.xlane.f32.xlu1 %v904_v2 }
 0x28e   :  { %v864_v3 = vpop.xlane.xlu0 %863 }
 0x28f   :  { %v882_v5 = vsub.f32 %v481_v39, %v864_v3 }
 0x291   :  { %v892_v6 = vmul.f32 1.442695, %v882_v5 }
 0x293   :  { %2301 = vpow2.f32 %v892_v6 }
 0x296   :  { %v867_v7 = vpop.xlane.xlu0 %866 }
 0x297   :  { %v883_v8 = vsub.f32 %v555_v42, %v867_v7  ;;  %v870_v11 = vpop.xlane.xlu1 %869 }
 0x298   :  { %v884_v12 = vsub.f32 %v629_v43, %v870_v11 }
 0x299   :  { %v894_v13 = vmul.f32 1.442695, %v883_v8 }
 0x29a   :  { %v896_v14 = vmul.f32 1.442695, %v884_v12  ;;  %v873_v15 = vpop.xlane.xlu0 %872 }
 0x29b   :  { %2303 = vpow2.f32 %v894_v13  ;;  %v885_v16 = vsub.f32 %v703_v48, %v873_v15 }
 0x29c   :  { %2305 = vpow2.f32 %v896_v14 }
 0x29d   :  { %v898_v17 = vmul.f32 1.442695, %v885_v16 }
 0x29e   :  { %v879_v18 = vpop.xlane.xlu0 %878 }
 0x29f   :  { %2307 = vpow2.f32 %v898_v17  ;;  %v887_v19 = vsub.f32 %v851_v51, %v879_v18  ;;  %v876_v20 = vpop.xlane.xlu1 %875 }
 0x2a0   :  { %v2572_v21 = vpop.eup %2301  ;;  %v886_v22 = vsub.f32 %v777_v52, %v876_v20 }
 0x2a1   :  { %v902_v23 = vmul.f32 1.442695, %v887_v19  ;;  %v910_v24 = vsel %vm855_vm2, %v2572_v21, 0.0 }
 0x2a2   :  { %v900_v25 = vmul.f32 1.442695, %v886_v22  ;;  %911 = vadd.xlane.f32.xlu1 %v910_v24 }
 0x2a3   :  { %2309 = vpow2.f32 %v902_v23  ;;  %v245_v43 = vpop.permute.xlu1 %244 }
 0x2a4   :  { %2311 = vpow2.f32 %v900_v25 }
 0x2a8   :  { %v2576_v26 = vpop.eup %2303 }
 0x2a9   :  { %v2578_v27 = vpop.eup %2305  ;;  %v913_v28 = vsel %vm855_vm2, %v2576_v26, 0.0 }
 0x2aa   :  { %914 = vadd.xlane.f32.xlu0 %v913_v28  ;;  %v916_v30 = vsel %vm855_vm2, %v2578_v27, 0.0 }
 0x2ab   :  { %917 = vadd.xlane.f32.xlu1 %v916_v30 }
 0x2ac   :  { %v2584_v31 = vpop.eup %2307 }
 0x2ad   :  { %v919_v33 = vsel %vm855_vm2, %v2584_v31, 0.0 }
 0x2ae   :  { %920 = vadd.xlane.f32.xlu0 %v919_v33  ;;  %v1599_v33 = vld [vmem:[%s2802_s2 + $0x78] sm:$0xff] }
 0x2b0   :  { %v2588_v34 = vpop.eup %2309 }
 0x2b1   :  { %v2590_v35 = vpop.eup %2311  ;;  %v925_v36 = vsel %vm855_vm2, %v2588_v34, 0.0 }
 0x2b2   :  { %926 = vadd.xlane.f32.xlu0 %v925_v36  ;;  %v922_v37 = vsel %vm855_vm2, %v2590_v35, 0.0  ;;  %v1598_v36 = vld [vmem:[%s2802_s2 + $0x70] sm:$0xff] }
 0x2b3   :  { %923 = vadd.xlane.f32.xlu1 %v922_v37  ;;  %v1594_v37 = vld [vmem:[%s2802_s2 + $0x50] sm:$0xff] }
 0x2bc   :  { %v909_v38 = vpop.xlane.xlu0 %908 }
 0x2bd   :  { %2313 = vrcp.f32 %v909_v38 }
 0x2c4   :  { %251 = vrot.lane.b32.xlu1 %v2544_v32, %s2362_s1 }
 0x2c8   :  { %248 = vrot.lane.b32.xlu0 %v2536_v29, %s2361_s30  ;;  %254 = vrot.lane.b32.xlu1 %v2536_v29, %s2362_s1 }
 0x2ca   :  { %v2314_v39 = vpop.eup %2313 }
 0x2cb   :  { %v937_v40 = vmul.f32 %v2314_v39, %v909_v38  ;;  %v1593_v38 = vld [vmem:[%s2802_s2 + $0x48] sm:$0xff] }
 0x2cc   :  { %257 = vrot.lane.b32.xlu0 %v2544_v32, %s2363_s13  ;;  %260 = vrot.lane.b32.xlu1 %v2536_v29, %s2363_s13 }
 0x2cd   :  { %v945_v41 = vsub.f32 2.0, %v937_v40  ;;  %v1591_v40 = vld [vmem:[%s2802_s2 + $0x38] sm:$0xff] }
 0x2cf   :  { %v953_v42 = vmul.f32 %v2314_v39, %v945_v41  ;;  %v1592_v39 = vld [vmem:[%s2802_s2 + $0x40] sm:$0xff]  ;;  %v1590_v41 = vld [vmem:[%s2802_s2 + $0x30] sm:$0xff] }
 0x2d1   :  { %v961_v44 = vmul.f32 %v2564_v61, %v953_v42 }
 0x2d3   :  { %2161 = vmatmul.mubr.msk.f32.vlgmr.msra.gmra.mxu0 %vm855_vm2, %v961_v44  ;;  %v1589_v44 = vld [vmem:[%s2802_s2 + $0x28] sm:$0xff] }
 0x2d4   :  { %v906_v45 = vpop.xlane.xlu1 %905  ;;  %2170 = vmatprep.mubr.msk.f32.mxu0 %vm2360_vm1, %v2359_v4 }
 0x2d5   :  { %2315 = vrcp.f32 %v906_v45 }
 0x2e2   :  { %v2316_v46 = vpop.eup %2315 }
 0x2e3   :  { %v936_v47 = vmul.f32 %v2316_v46, %v906_v45 }
 0x2e5   :  { %v944_v48 = vsub.f32 2.0, %v936_v47 }
 0x2e7   :  { %v952_v49 = vmul.f32 %v2316_v46, %v944_v48  ;;  %v1588_v46 = vld [vmem:[%s2802_s2 + $0x20] sm:$0xff]  ;;  %v1587_v48 = vld [vmem:[%s2802_s2 + $0x18] sm:$0xff] }
 0x2e9   :  { %v960_v32 = vmul.f32 %v2568_v1, %v952_v49  ;;  %v1586_v49 = vld [vmem:[%s2802_s2 + $0x10] sm:$0xff] }
 0x2eb   :  { %2156 = vmatmul.mubr.msk.f32.vlgmr.msra.gmra.mxu1 %vm855_vm2, %v960_v32  ;;  %v1585_v32 = vld [vmem:[%s2802_s2 + $0x8] sm:$0xff] }
 0x2ec   :  { %2164 = vmatpush3.msra.mxu1 %v245_v43  ;;  %2165 = vmatprep.mubr.msk.f32.mxu1 %vm2360_vm1, %v2359_v4 }
 0x2ed   :  { %2173 = vmatprep.subr.mxu1 %v2359_v4 }
 0x32b   :  { %v912_v29 = vpop.xlane.xlu1 %911 }
 0x32c   :  { %2317 = vrcp.f32 %v912_v29 }
 0x333   :  { %v915_v50 = vpop.xlane.xlu0 %914 }
 0x334   :  { %2319 = vrcp.f32 %v915_v50  ;;  %v918_v51 = vpop.xlane.xlu1 %917 }
 0x335   :  { %2321 = vrcp.f32 %v918_v51 }
 0x337   :  { %v921_v52 = vpop.xlane.xlu0 %920 }
 0x338   :  { %2323 = vrcp.f32 %v921_v52 }
 0x339   :  { %v2318_v53 = vpop.eup %2317 }
 0x33a   :  { %v938_v54 = vmul.f32 %v2318_v53, %v912_v29  ;;  %v1584_v29 = vld [vmem:[%s2802_s2] sm:$0xff] }
 0x33b   :  { %v927_v55 = vpop.xlane.xlu0 %926 }
 0x33c   :  { %v946_v56 = vsub.f32 2.0, %v938_v54  ;;  %2325 = vrcp.f32 %v927_v55  ;;  %v924_v57 = vpop.xlane.xlu1 %923 }
 0x33d   :  { %2327 = vrcp.f32 %v924_v57 }
 0x33e   :  { %v954_v58 = vmul.f32 %v2318_v53, %v946_v56 }
 0x33f   :  { %v249_v59 = vpop.permute.xlu0 %248 }
 0x340   :  { %v962_v60 = vmul.f32 %v2572_v21, %v954_v58  ;;  %2169 = vmatpush3.msra.mxu0 %v249_v59  ;;  %v252_v61 = vpop.permute.xlu1 %251 }
 0x341   :  { %v2320_v62 = vpop.eup %2319  ;;  %2178 = vmatprep.subr.mxu0 %v2359_v4 }
 0x342   :  { %v2322_v63 = vpop.eup %2321  ;;  %v939_v0 = vmul.f32 %v2320_v62, %v915_v50  ;;  %2166 = vmatmul.mubr.msk.f32.vlgmr.msra.gmra.mxu1 %vm855_vm2, %v962_v60 }
 0x343   :  { %v940_v1 = vmul.f32 %v2322_v63, %v918_v51  ;;  %2174 = vmatpush3.msra.mxu1 %v252_v61  ;;  %2175 = vmatprep.mubr.msk.f32.mxu1 %vm2360_vm1, %v2359_v4  ;;  %v258_v20 = vpop.permute.xlu0 %257 }
 0x344   :  { %v947_v2 = vsub.f32 2.0, %v939_v0  ;;  %2183 = vmatprep.subr.mxu1 %v2359_v4  ;;  %v255_v13 = vpop.permute.xlu1 %254 }
 0x345   :  { %v2324_v3 = vpop.eup %2323  ;;  %v948_v5 = vsub.f32 2.0, %v940_v1 }
 0x346   :  { %v955_v6 = vmul.f32 %v2320_v62, %v947_v2  ;;  %v941_v7 = vmul.f32 %v2324_v3, %v921_v52 }
 0x347   :  { %v956_v8 = vmul.f32 %v2322_v63, %v948_v5 }
 0x348   :  { %v963_v11 = vmul.f32 %v2576_v26, %v955_v6  ;;  %v949_v12 = vsub.f32 2.0, %v941_v7  ;;  %v261_v25 = vpop.permute.xlu1 %260 }
 0x349   :  { %v2326_v14 = vpop.eup %2325  ;;  %v964_v15 = vmul.f32 %v2578_v27, %v956_v8 }
 0x34a   :  { %v2328_v16 = vpop.eup %2327  ;;  %v957_v17 = vmul.f32 %v2324_v3, %v949_v12  ;;  %v943_v18 = vmul.f32 %v2326_v14, %v927_v55  ;;  %2171 = vmatmul.mubr.msk.f32.vlgmr.msra.gmra.mxu0 %vm855_vm2, %v963_v11 }
 0x34b   :  { %v942_v19 = vmul.f32 %v2328_v16, %v924_v57  ;;  %2179 = vmatpush3.msra.mxu0 %v255_v13  ;;  %2176 = vmatmul.mubr.msk.f32.vlgmr.msra.gmra.mxu1 %vm855_vm2, %v964_v15 }
 0x34c   :  { %v965_v21 = vmul.f32 %v2584_v31, %v957_v17  ;;  %v951_v22 = vsub.f32 2.0, %v943_v18  ;;  %2184 = vmatpush3.msra.mxu1 %v258_v20  ;;  %2180 = vmatprep.mubr.msk.f32.mxu0 %vm2360_vm1, %v2359_v4  ;;  %v2013_v17 = vld [vmem:[%s2803_s3] ss:$0 sm:$0xff] }
 0x34d   :  { %v950_v23 = vsub.f32 2.0, %v942_v19  ;;  %2188 = vmatprep.subr.mxu0 %v2359_v4  ;;  %2185 = vmatprep.mubr.msk.f32.mxu1 %vm2360_vm1, %v2359_v4 }
 0x34e   :  { %v959_v24 = vmul.f32 %v2326_v14, %v951_v22  ;;  %2181 = vmatmul.mubr.msk.f32.vlgmr.msra.gmra.mxu0 %vm855_vm2, %v965_v21  ;;  %2193 = vmatprep.subr.mxu1 %v1599_v33 }
 0x34f   :  { %v958_v26 = vmul.f32 %v2328_v16, %v950_v23  ;;  %2189 = vmatpush3.msra.mxu0 %v261_v25  ;;  %2190 = vmatprep.mubr.msk.f32.mxu0 %vm2360_vm1, %v2359_v4  ;;  %v1597_v4 = vld [vmem:[%s2802_s2 + $0x68] sm:$0xff] }
 0x350   :  { %v967_v27 = vmul.f32 %v2588_v34, %v959_v24  ;;  %v1596_v34 = vld [vmem:[%s2802_s2 + $0x60] sm:$0xff] }
 0x351   :  { %v966_v28 = vmul.f32 %v2590_v35, %v958_v26  ;;  %v1595_v35 = vld [vmem:[%s2802_s2 + $0x58] sm:$0xff] }
 0x352   :  { %2191 = vmatmul.mubr.msk.f32.vlgmr.msra.gmra.mxu0 %vm855_vm2, %v967_v27 }
 0x353   :  { %2186 = vmatmul.mubr.msk.f32.vlgmr.msra.gmra.mxu1 %vm855_vm2, %v966_v28 }
 0x354   :  { %2194 = vmatpush3.msra.mxu1 %v1599_v33 }
 0x355   :  { %2195 = vmatprep.subr.mxu1 %v1598_v36 }
 0x356   :  { %2196 = vmatpush3.msra.mxu1 %v1598_v36 }
 0x357   :  { %2197 = vmatprep.subr.mxu1 %v1597_v4 }
 0x358   :  { %2198 = vmatpush3.msra.mxu1 %v1597_v4 }
 0x359   :  { %2199 = vmatprep.subr.mxu1 %v1596_v34 }
 0x35a   :  { %2200 = vmatpush3.msra.mxu1 %v1596_v34 }
 0x35b   :  { %2201 = vmatprep.subr.mxu1 %v1595_v35 }
 0x35c   :  { %2202 = vmatpush3.msra.mxu1 %v1595_v35  ;;  %v1731_v35 = vld [vmem:[%s2806_s6 + $0x10] sm:$0xff] }
 0x35d   :  { %2203 = vmatprep.subr.mxu1 %v1594_v37 }
 0x35e   :  { %2204 = vmatpush3.msra.mxu1 %v1594_v37  ;;  %v1730_v37 = vld [vmem:[%s2806_s6 + $0x8] sm:$0xff] }
 0x35f   :  { %2205 = vmatprep.subr.mxu1 %v1593_v38 }
 0x360   :  { %2206 = vmatpush3.msra.mxu1 %v1593_v38  ;;  %v1729_v38 = vld [vmem:[%s2806_s6] sm:$0xff] }
 0x361   :  { %2207 = vmatprep.subr.mxu1 %v1592_v39 }
 0x362   :  { %2208 = vmatpush3.msra.mxu1 %v1592_v39  ;;  %v1838_v39 = vld [vmem:[%s2808_s8 + $0x78] sm:$0xff] }
 0x363   :  { %2209 = vmatprep.subr.mxu1 %v1591_v40 }
 0x364   :  { %2210 = vmatpush3.msra.mxu1 %v1591_v40 }
 0x365   :  { %2211 = vmatprep.subr.mxu1 %v1590_v41 }
 0x366   :  { %2212 = vmatpush3.msra.mxu1 %v1590_v41 }
 0x367   :  { %2213 = vmatprep.subr.mxu1 %v1589_v44 }
 0x368   :  { %2214 = vmatpush3.msra.mxu1 %v1589_v44 }
 0x369   :  { %2215 = vmatprep.subr.mxu1 %v1588_v46 }
 0x36a   :  { %2216 = vmatpush3.msra.mxu1 %v1588_v46 }
 0x36b   :  { %2217 = vmatprep.subr.mxu1 %v1587_v48 }
 0x36c   :  { %2218 = vmatpush3.msra.mxu1 %v1587_v48 }
 0x36d   :  { %2219 = vmatprep.subr.mxu1 %v1586_v49 }
 0x36e   :  { %2220 = vmatpush3.msra.mxu1 %v1586_v49 }
 0x36f   :  { %2221 = vmatprep.subr.mxu1 %v1585_v32 }
 0x370   :  { %2222 = vmatpush3.msra.mxu1 %v1585_v32 }
 0x371   :  { %2223 = vmatprep.subr.mxu1 %v1584_v29 }
 0x372   :  { %2224 = vmatpush3.msra.mxu1 %v1584_v29 }
 0x393   :  { %v2638_v30 = vpop.f32.mrf.mxu0 }
 0x395   :  { %v2162_v31 = vpop.f32.mrf.mxu0 }
 0x3ab   :  { %v1037_v42 = vpop.f32.mrf.mxu1 }
 0x3ad   :  { %v2157_v43 = vpop.f32.mrf.mxu1 }
 0x402   :  { %v1183_v45 = vpop.f32.mrf.mxu1 }
 0x404   :  { %v2167_v47 = vpop.f32.mrf.mxu1 }
 0x405   :  { %v2014_v47 = vld [vmem:[%s2804_s4] ss:$0 sm:$0xff] }
 0x40a   :  { %v1256_v50 = vpop.f32.mrf.mxu0 }
 0x40b   :  { %v2282_v51 = vpack.i.bf16 %v1256_v50, %v1183_v45  ;;  %v1329_v52 = vpop.f32.mrf.mxu1  ;;  %v2015_v50 = vld [vmem:[%s2805_s5] ss:$0 sm:$0xff] }
 0x40c   :  { %v2172_v53 = vpop.f32.mrf.mxu0 }
 0x40d   :  { %2283 = vrot.lane.b32.xlu0 %v2282_v51, %s2363_s13  ;;  %v2177_v54 = vpop.f32.mrf.mxu1 }
 0x40e   :  { %v1402_v55 = vpop.f32.mrf.mxu0  ;;  %v1837_v54 = vld [vmem:[%s2808_s8 + $0x70] sm:$0xff] }
 0x40f   :  { %v2287_v56 = vpack.i.bf16 %v1402_v55, %v1329_v52  ;;  %v1836_v55 = vld [vmem:[%s2808_s8 + $0x68] sm:$0xff] }
 0x410   :  { %v2182_v57 = vpop.f32.mrf.mxu0 }
 0x411   :  { %2288 = vrot.lane.b32.xlu1 %v2287_v56, %s2362_s1  ;;  %v1835_v56 = vld [vmem:[%s2808_s8 + $0x60] sm:$0xff]  ;;  %v1834_v57 = vld [vmem:[%s2808_s8 + $0x58] sm:$0xff] }
 0x412   :  { %v1548_v58 = vpop.f32.mrf.mxu0 }
 0x413   :  { %v1475_v59 = vpop.f32.mrf.mxu1 }
 0x414   :  { %v2292_v60 = vpack.i.bf16 %v1548_v58, %v1475_v59  ;;  %v2192_v61 = vpop.f32.mrf.mxu0  ;;  %v1833_v58 = vld [vmem:[%s2808_s8 + $0x50] sm:$0xff]  ;;  %v1832_v59 = vld [vmem:[%s2808_s8 + $0x48] sm:$0xff] }
 0x415   :  { %v2187_v62 = vpop.f32.mrf.mxu1  ;;  %v1830_v61 = vld [vmem:[%s2808_s8 + $0x38] sm:$0xff] }
 0x416   :  { %2293 = vrot.lane.b32.xlu0 %v2292_v60, %s2361_s30  ;;  %v1831_v60 = vld [vmem:[%s2808_s8 + $0x40] sm:$0xff]  ;;  %v1829_v62 = vld [vmem:[%s2808_s8 + $0x30] sm:$0xff]  ;;  %s2364_s30 = smov [#allocation2]  }
 0x417   :  { %s1974_s3 = sshll.u32 %s2364_s30, 4  ;;  %s1975_s3 = int_to_ptr.vmem [resolvable:$true] %s1974_s3 }
 0x418   :  { %s2337_s1 = scalar_lea.vmem %s1975_s3, 256  ;;  %p2342_p1 = scmp.lt.s32.totalorder %s1975_s3, %s1975_s3 }
 0x419   :  { %p2338_p0 = scmp.ne.s32.totalorder %s1975_s3, %s2337_s1  ;;  %p2343_p2 = scmp.lt.s32.totalorder %s2337_s1, %s2337_s1 }
 0x41b   :  { %p2344_p3 = por %p2343_p2, %p2342_p1 }
 0x41d   :  { %p2345_p4 = pnand %p2344_p3, %p2338_p0 }
 0x47f   :  { %v2284_v63 = vpop.permute.xlu0 %2283 }
 0x480   :  { %v2286_v1 = vunpack.i.h.bf16 %v2284_v63  ;;  %v2285_v2 = vunpack.i.l.bf16 %v2284_v63  ;;  %v1828_v63 = vld [vmem:[%s2808_s8 + $0x28] sm:$0xff] }
 0x482   :  { %v1581_v7 = vsel %vm56_vm0, %v2638_v30, %v2286_v1  ;;  %v1564_v12 = vsel %vm56_vm0, %v1037_v42, %v2285_v2  ;;  %v1826_v1 = vld [vmem:[%s2808_s8 + $0x18] sm:$0xff]  ;;  %v1825_v2 = vld [vmem:[%s2808_s8 + $0x10] sm:$0xff] }
 0x483   :  { %v2289_v0 = vpop.permute.xlu1 %2288 }
 0x484   :  { %v2291_v3 = vunpack.i.h.bf16 %v2289_v0  ;;  %v2290_v5 = vunpack.i.l.bf16 %v2289_v0  ;;  %v1827_v0 = vld [vmem:[%s2808_s8 + $0x20] sm:$0xff] }
 0x486   :  { %v1566_v13 = vsel %vm1565_vm3, %v1564_v12, %v2290_v5  ;;  %v1582_v14 = vsel %vm1565_vm3, %v1581_v7, %v2291_v3  ;;  %v1824_v3 = vld [vmem:[%s2808_s8 + $0x8] sm:$0xff]  ;;  %v1823_v5 = vld [vmem:[%s2808_s8] sm:$0xff] }
 0x488   :  { %v2294_v6 = vpop.permute.xlu0 %2293 }
 0x489   :  { %v2296_v8 = vunpack.i.h.bf16 %v2294_v6  ;;  %v2295_v11 = vunpack.i.l.bf16 %v2294_v6  ;;  %v2016_v6 = vld [vmem:[%s2807_s7] ss:$0 sm:$0xff] }
 0x48b   :  { %v1568_v15 = vsel %vm1567_vm4, %v1566_v13, %v2295_v11  ;;  %v1583_v16 = vsel %vm1567_vm4, %v1582_v14, %v2296_v8 }
 0x48c   :  { %2225 = vmatprep.mubr.f32.mxu1 %v1568_v15  ;;  %v2019_v15 = vld [vmem:[%s2809_s9] ss:$0 sm:$0xff] }
 0x48d   :  { %2226 = vmatmul.mubr.f32.vlgmr.msra.gmra.mxu1 %v1583_v16 }
 0x54d   :  { %v2227_v18 = vpop.f32.mrf.mxu1 }
 0x54e   :  { %v1679_v19 = vadd.f32 %v2227_v18, %v2013_v17 }
 0x54f   :  { %v1673_v20 = vpop.f32.mrf.mxu1 }
 0x550   :  { %v1674_v21 = vadd.f32 %v2013_v17, %v1673_v20  ;;  %v1683_v22 = vadd.f32 %v1679_v19, %v2469_v10 }
 0x552   :  { %v1689_v23 = vsel %vm56_vm0, %v1683_v22, 0.0  ;;  %v1682_v24 = vadd.f32 %v1674_v21, %v2461_v9  ;;  %v1732_v9 = vld [vmem:[%s2806_s6 + $0x18] sm:$0xff] }
 0x553   :  { %1690 = vadd.xlane.f32.xlu0 %v1689_v23  ;;  %2228 = vmatprep.subr.mxu0 %v1732_v9 }
 0x554   :  { %v1686_v25 = vsel %vm56_vm0, %v1682_v24, 0.0  ;;  %2229 = vmatpush3.msra.mxu0 %v1732_v9 }
 0x555   :  { %1687 = vadd.xlane.f32.xlu1 %v1686_v25  ;;  %2230 = vmatprep.subr.mxu0 %v1731_v35 }
 0x556   :  { %2231 = vmatpush3.msra.mxu0 %v1731_v35 }
 0x557   :  { %2232 = vmatprep.subr.mxu0 %v1730_v37 }
 0x558   :  { %2233 = vmatpush3.msra.mxu0 %v1730_v37 }
 0x559   :  { %2234 = vmatprep.subr.mxu0 %v1729_v38 }
 0x55a   :  { %2235 = vmatpush3.msra.mxu0 %v1729_v38 }
 0x55b   :  { %2239 = vmatprep.subr.mxu0 %v1838_v39 }
 0x5dc   :  { %v1691_v26 = vpop.xlane.xlu0 %1690 }
 0x5dd   :  { %v1694_v27 = vmul.f32 0.03125, %v1691_v26 }
 0x5de   :  { %v1688_v28 = vpop.xlane.xlu1 %1687 }
 0x5df   :  { %v1696_v30 = vsub.f32 %v1683_v22, %v1694_v27  ;;  %v1693_v31 = vmul.f32 0.03125, %v1688_v28 }
 0x5e1   :  { %v1695_v33 = vsub.f32 %v1682_v24, %v1693_v31  ;;  %v1698_v36 = vmul.f32 %v1696_v30, %v1696_v30 }
 0x5e3   :  { %v1702_v4 = vsel %vm56_vm0, %v1698_v36, 0.0  ;;  %v1697_v34 = vmul.f32 %v1695_v33, %v1695_v33 }
 0x5e4   :  { %1703 = vadd.xlane.f32.xlu1 %v1702_v4 }
 0x5e5   :  { %v1699_v10 = vsel %vm56_vm0, %v1697_v34, 0.0 }
 0x5e6   :  { %1700 = vadd.xlane.f32.xlu0 %v1699_v10 }
 0x66d   :  { %v1704_v40 = vpop.xlane.xlu1 %1703 }
 0x66e   :  { %v1706_v41 = vmul.f32 0.03125, %v1704_v40  ;;  %v2020_v40 = vld [vmem:[%s2810_s10] ss:$0 sm:$0xff] }
 0x66f   :  { %v1701_v42 = vpop.xlane.xlu0 %1700 }
 0x670   :  { %v1708_v43 = vadd.f32 1e-05, %v1706_v41  ;;  %v1705_v44 = vmul.f32 0.03125, %v1701_v42 }
 0x672   :  { %2329 = vrsqrt.f32 %v1708_v43  ;;  %v1707_v45 = vadd.f32 1e-05, %v1705_v44  ;;  %v2021_v43 = vld [vmem:[%s2811_s11] ss:$0 sm:$0xff] }
 0x674   :  { %2331 = vrsqrt.f32 %v1707_v45 }
 0x67f   :  { %v2330_v46 = vpop.eup %2329 }
 0x680   :  { %v1712_v48 = vmul.f32 %v2330_v46, %v1696_v30 }
 0x681   :  { %v2332_v49 = vpop.eup %2331 }
 0x682   :  { %v1711_v32 = vmul.f32 %v2332_v49, %v1695_v33  ;;  %v1720_v29 = vmul.f32 %v2014_v47, %v1712_v48 }
 0x684   :  { %v1719_v51 = vmul.f32 %v2014_v47, %v1711_v32  ;;  %v2726_v53 = vadd.f32 %v2015_v50, %v1720_v29 }
 0x686   :  { %v2724_v52 = vadd.f32 %v2015_v50, %v1719_v51 }
 0x688   :  { %2236 = vmatprep.mubr.msk.f32.mxu0 %vm56_vm0, %v2724_v52 }
 0x689   :  { %2237 = vmatmul.mubr.msk.f32.vlgmr.msra.gmra.mxu0 %vm56_vm0, %v2726_v53 }
 0x68a   :  { %2240 = vmatpush3.msra.mxu0 %v1838_v39 }
 0x68b   :  { %2241 = vmatprep.subr.mxu0 %v1837_v54 }
 0x68c   :  { %2242 = vmatpush3.msra.mxu0 %v1837_v54 }
 0x68d   :  { %2243 = vmatprep.subr.mxu0 %v1836_v55 }
 0x68e   :  { %2244 = vmatpush3.msra.mxu0 %v1836_v55 }
 0x68f   :  { %2245 = vmatprep.subr.mxu0 %v1835_v56 }
 0x690   :  { %2246 = vmatpush3.msra.mxu0 %v1835_v56 }
 0x691   :  { %2247 = vmatprep.subr.mxu0 %v1834_v57 }
 0x692   :  { %2248 = vmatpush3.msra.mxu0 %v1834_v57 }
 0x693   :  { %2249 = vmatprep.subr.mxu0 %v1833_v58 }
 0x694   :  { %2250 = vmatpush3.msra.mxu0 %v1833_v58 }
 0x695   :  { %2251 = vmatprep.subr.mxu0 %v1832_v59 }
 0x696   :  { %2252 = vmatpush3.msra.mxu0 %v1832_v59 }
 0x697   :  { %2253 = vmatprep.subr.mxu0 %v1831_v60 }
 0x698   :  { %2254 = vmatpush3.msra.mxu0 %v1831_v60 }
 0x699   :  { %2255 = vmatprep.subr.mxu0 %v1830_v61 }
 0x69a   :  { %2256 = vmatpush3.msra.mxu0 %v1830_v61 }
 0x69b   :  { %2257 = vmatprep.subr.mxu0 %v1829_v62 }
 0x69c   :  { %2258 = vmatpush3.msra.mxu0 %v1829_v62 }
 0x69d   :  { %2259 = vmatprep.subr.mxu0 %v1828_v63 }
 0x69e   :  { %2260 = vmatpush3.msra.mxu0 %v1828_v63 }
 0x69f   :  { %2261 = vmatprep.subr.mxu0 %v1827_v0 }
 0x6a0   :  { %2262 = vmatpush3.msra.mxu0 %v1827_v0 }
 0x6a1   :  { %2263 = vmatprep.subr.mxu0 %v1826_v1 }
 0x6a2   :  { %2264 = vmatpush3.msra.mxu0 %v1826_v1 }
 0x6a3   :  { %2265 = vmatprep.subr.mxu0 %v1825_v2 }
 0x6a4   :  { %2266 = vmatpush3.msra.mxu0 %v1825_v2 }
 0x6a5   :  { %2267 = vmatprep.subr.mxu0 %v1824_v3 }
 0x6a6   :  { %2268 = vmatpush3.msra.mxu0 %v1824_v3 }
 0x6a7   :  { %2269 = vmatprep.subr.mxu0 %v1823_v5 }
 0x6a8   :  { %2270 = vmatpush3.msra.mxu0 %v1823_v5 }
 0x749   :  { %v2238_v7 = vpop.f32.mrf.mxu0 }
 0x74a   :  { %v1818_v8 = vadd.f32 %v2238_v7, %v2016_v6 }
 0x74b   :  { %v1812_v11 = vpop.f32.mrf.mxu0 }
 0x74c   :  { %v1813_v12 = vadd.f32 %v2016_v6, %v1812_v11  ;;  %v1822_v14 = vmax.f32 %v1818_v8, 0.0 }
 0x74e   :  { %v1821_v13 = vmax.f32 %v1813_v12, 0.0 }
 0x750   :  { %2271 = vmatprep.mubr.f32.mxu0 %v1821_v13 }
 0x751   :  { %2272 = vmatmul.mubr.f32.vlgmr.msra.gmra.mxu0 %v1822_v14 }
 0x811   :  { %v2273_v16 = vpop.f32.mrf.mxu0 }
 0x812   :  { %v1918_v17 = vadd.f32 %v2273_v16, %v2019_v15 }
 0x813   :  { %v1912_v18 = vpop.f32.mrf.mxu0 }
 0x814   :  { %v1913_v19 = vadd.f32 %v2019_v15, %v1912_v18  ;;  %v1922_v20 = vadd.f32 %v1918_v17, %v2726_v53 }
 0x816   :  { %v1928_v21 = vsel %vm56_vm0, %v1922_v20, 0.0  ;;  %v1921_v22 = vadd.f32 %v1913_v19, %v2724_v52 }
 0x817   :  { %1929 = vadd.xlane.f32.xlu1 %v1928_v21 }
 0x818   :  { %v1925_v23 = vsel %vm56_vm0, %v1921_v22, 0.0 }
 0x819   :  { %1926 = vadd.xlane.f32.xlu0 %v1925_v23 }
 0x8a0   :  { %v1930_v24 = vpop.xlane.xlu1 %1929 }
 0x8a1   :  { %v1932_v25 = vmul.f32 0.03125, %v1930_v24 }
 0x8a2   :  { %v1927_v26 = vpop.xlane.xlu0 %1926 }
 0x8a3   :  { %v1934_v27 = vsub.f32 %v1922_v20, %v1932_v25  ;;  %v1931_v28 = vmul.f32 0.03125, %v1927_v26 }
 0x8a5   :  { %v1933_v30 = vsub.f32 %v1921_v22, %v1931_v28  ;;  %v1936_v31 = vmul.f32 %v1934_v27, %v1934_v27 }
 0x8a7   :  { %v1940_v33 = vsel %vm56_vm0, %v1936_v31, 0.0  ;;  %v1935_v36 = vmul.f32 %v1933_v30, %v1933_v30 }
 0x8a8   :  { %1941 = vadd.xlane.f32.xlu1 %v1940_v33 }
 0x8a9   :  { %v1937_v4 = vsel %vm56_vm0, %v1935_v36, 0.0 }
 0x8aa   :  { %1938 = vadd.xlane.f32.xlu0 %v1937_v4 }
 0x931   :  { %v1942_v34 = vpop.xlane.xlu1 %1941 }
 0x932   :  { %v1944_v10 = vmul.f32 0.03125, %v1942_v34 }
 0x933   :  { %v1939_v9 = vpop.xlane.xlu0 %1938 }
 0x934   :  { %v1946_v35 = vadd.f32 1e-05, %v1944_v10  ;;  %v1943_v37 = vmul.f32 0.03125, %v1939_v9 }
 0x936   :  { %2333 = vrsqrt.f32 %v1946_v35  ;;  %v1945_v38 = vadd.f32 1e-05, %v1943_v37 }
 0x938   :  { %2335 = vrsqrt.f32 %v1945_v38 }
 0x943   :  { %v2334_v39 = vpop.eup %2333 }
 0x944   :  { %v1950_v41 = vmul.f32 %v2334_v39, %v1934_v27 }
 0x945   :  { %v2336_v42 = vpop.eup %2335 }
 0x946   :  { %v1949_v44 = vmul.f32 %v2336_v42, %v1933_v30  ;;  %v1958_v45 = vmul.f32 %v2020_v40, %v1950_v41 }
 0x948   :  { %v1957_v46 = vmul.f32 %v2020_v40, %v1949_v44  ;;  %v1966_v47 = vadd.f32 %v2021_v43, %v1958_v45 }
 0x94a   :  { %v1965_v48 = vadd.f32 %v2021_v43, %v1957_v46  ;;  %1968 = vst.msk [vmem:[#allocation2 + $0x8] sm:$0xff] %vm56_vm0, %v1966_v47 }
 0x94c   :  { %1967 = vst.msk [vmem:[#allocation2] sm:$0xff] %vm56_vm0, %v1965_v48 }
 0x94d   :  { %2348 = shalt.err (!%p2345_p4)
}
 0x94e   :  { %s2365_s10 = smov 128   ;;  %s2366_s11 = smov 8  }
 0x94f   :  { %1980 = dma.vmem_to_hbm [thread:$0]  %s1975_s3, 256, %s2812_s12, [#allocation3], %s2365_s10, %s2365_s10, %s2366_s11  }
 0x950   :  { %2357 = dma.done.wait [#allocation3], 256  }
 0x951   :  { %2358 = vsyncadd [#allocation3], 4294967040 }
 0x952   :  { %1984 = vsyncpa [#allocation3], 1 }

</bundles_post_ra>
